<compile_context>
chip_gen: v7x
topology: tpu7x:2x2x1
jax: 0.10.0
libtpu: 0.0.40
codegen_flags: <defaults>
</compile_context>

<pallas_src>
import math

import jax
import jax.numpy as jnp
from jax import lax
from jax.experimental import pallas as pl
from jax.experimental.pallas import tpu as pltpu

# ---- small shapes consistent with the module ---------------------------------
BATCH = 2
SEQ_LEN = 8
C_IN = 4
D_MODEL = 128   # lane-dense (feedback #2); real gpt4ts uses 768 (also a multiple of 128)

# TemporalEmbedding (embed_type='fixed', freq='h'); x_mark columns = [month, day, weekday, hour]
TABLE_SIZES = (13, 32, 7, 24)
TABLE_OFFSETS = (0, 13, 45, 52)
TABLE_TOTAL = 76


# ---- Pallas kernel ------------------------------------------------------------
def data_embedding_kernel(x_ref, idx_ref, wconv_ref, wtab_ref, o_ref):
    # x_ref    : (B, L, C)     f32  raw series
    # idx_ref  : (B*L, 5)      i32  [month|day|weekday|hour|position], table offsets pre-added
    # wconv_ref: (3, C, D)     f32  conv taps; tap k multiplies x[(l-1+k) % L]
    # wtab_ref : (76 + L, D)   f32  [month|day|weekday|hour tables | pe[:L]]
    # o_ref    : (B*L, D)      f32  lane-dense output slab
    B, L, C = x_ref.shape
    M = B * L
    n_hot, _ = wtab_ref.shape

    x = x_ref[...]
    # Circular conv taps: roll the FULL (B,L,C) block along the sequence axis
    # (no per-batch loop).  jnp.roll -> slice+concat on the sublane axis; for
    # large L prefer pltpu.roll (XLU sublane rotate) - identical semantics.
    xm1 = jnp.roll(x, 1, axis=1).reshape(M, C)    # x[b, (l-1) % L, :]
    xp1 = jnp.roll(x, -1, axis=1).reshape(M, C)   # x[b, (l+1) % L, :]
    x0 = x.reshape(M, C)                          # leading-dim collapse: free relayout

    # Multi-hot (B*L, 76+L): 5 broadcast compares, OR-accumulated (offsets folded in wrapper).
    lane = lax.broadcasted_iota(jnp.int32, (M, n_hot), 1)
    idx = idx_ref[...]
    hot = lane == idx[:, 0:1]
    for f in range(1, idx.shape[1]):              # static 4-iteration unroll
        hot = hot | (lane == idx[:, f:f + 1])
    hot = hot.astype(jnp.float32)

    # Four accumulating MXU issues instead of one lane-concatenated operand.
    out = jnp.dot(hot, wtab_ref[...], preferred_element_type=jnp.float32)
    out += jnp.dot(xm1, wconv_ref[0], preferred_element_type=jnp.float32)
    out += jnp.dot(x0, wconv_ref[1], preferred_element_type=jnp.float32)
    out += jnp.dot(xp1, wconv_ref[2], preferred_element_type=jnp.float32)
    o_ref[...] = out.astype(o_ref.dtype)


# ---- wrapper ------------------------------------------------------------------
def data_embedding(x, x_mark, w_conv, w_tab):
    B, L, C = x.shape
    kc, c2, D = w_conv.shape
    n_hot = w_tab.shape[0]
    assert kc == 3 and c2 == C
    # Positional rows of w_tab are baked for a specific L; guard against misalignment.
    assert n_hot == TABLE_TOTAL + L, "w_tab positional rows must match seq_len"

    # Fold table offsets + positional index into one int32 index matrix (free XLA ops).
    # NOTE: like nn.Embedding, indices are assumed in-range; OOB marks would select a
    # neighbouring table's row instead of raising.
    offsets = jnp.asarray(TABLE_OFFSETS, dtype=jnp.int32)
    idx = x_mark.reshape(B * L, 4).astype(jnp.int32) + offsets[None, :]
    pos = (jnp.tile(jnp.arange(L, dtype=jnp.int32), B) + TABLE_TOTAL)[:, None]
    idx = jnp.concatenate([idx, pos], axis=-1)            # (B*L, 5)

    out2d = pl.pallas_call(
        data_embedding_kernel,
        out_shape=jax.ShapeDtypeStruct((B * L, D), jnp.float32),
        grid_spec=pltpu.PrefetchScalarGridSpec(
            num_scalar_prefetch=0,
            grid=(1,),                                    # toy size: single step (feedback #3/#7)
            in_specs=[
                pl.BlockSpec((B, L, C), lambda i: (0, 0, 0)),
                pl.BlockSpec((B * L, 5), lambda i: (0, 0)),
                pl.BlockSpec((3, C, D), lambda i: (0, 0, 0)),
                pl.BlockSpec((n_hot, D), lambda i: (0, 0)),
            ],
            out_specs=pl.BlockSpec((B * L, D), lambda i: (0, 0)),
        ),
        compiler_params=pltpu.CompilerParams(
            dimension_semantics=("arbitrary",)),
    )(x, idx, w_conv, w_tab)
    return out2d.reshape(B, L, D)                         # contiguous, free outside the kernel


# ---- deterministic parameter construction -------------------------------------
def sinusoid_table(n, d):
    # Same formula as PositionalEmbedding / FixedEmbedding.
    pos = jnp.arange(n, dtype=jnp.float32)[:, None]
    div = jnp.exp(jnp.arange(0, d, 2, dtype=jnp.float32) * (-math.log(10000.0) / d))
    tab = jnp.zeros((n, d), dtype=jnp.float32)
    tab = tab.at[:, 0::2].set(jnp.sin(pos * div))
    tab = tab.at[:, 1::2].set(jnp.cos(pos * div))
    return tab


def reference(x, x_mark, w_conv, tables, pe):
    # Pure-JAX faithful translation of DataEmbedding.forward (eval mode).
    B, L, C = x.shape
    xm1 = jnp.roll(x, 1, axis=1)
    xp1 = jnp.roll(x, -1, axis=1)
    conv = (jnp.einsum("blc,cd->bld", xm1, w_conv[0])
            + jnp.einsum("blc,cd->bld", x, w_conv[1])
            + jnp.einsum("blc,cd->bld", xp1, w_conv[2]))
    month_t, day_t, weekday_t, hour_t = tables
    temporal = (month_t[x_mark[..., 0]] + day_t[x_mark[..., 1]]
                + weekday_t[x_mark[..., 2]] + hour_t[x_mark[..., 3]])
    return conv + temporal + pe[None, :L]


if __name__ == "__main__":
    key = jax.random.PRNGKey(0)
    kx, km, kw = jax.random.split(key, 3)

    x = jax.random.normal(kx, (BATCH, SEQ_LEN, C_IN), dtype=jnp.float32)
    kmo, kd, kwd, kh = jax.random.split(km, 4)
    x_mark = jnp.stack([
        jax.random.randint(kmo, (BATCH, SEQ_LEN), 0, 13),   # month
        jax.random.randint(kd, (BATCH, SEQ_LEN), 0, 32),    # day
        jax.random.randint(kwd, (BATCH, SEQ_LEN), 0, 7),    # weekday
        jax.random.randint(kh, (BATCH, SEQ_LEN), 0, 24),    # hour
    ], axis=-1).astype(jnp.int32)

    # TokenEmbedding conv weight: kaiming_normal_(fan_in, leaky_relu), bias=False.
    # Stored as (3, C, D); to import real PyTorch Conv1d weights (D, C, 3), permute (2,1,0).
    gain = math.sqrt(2.0 / (1.0 + 0.01 ** 2))
    std = gain / math.sqrt(C_IN * 3)
    w_conv = jax.random.normal(kw, (3, C_IN, D_MODEL), dtype=jnp.float32) * std

    tables = [sinusoid_table(n, D_MODEL) for n in TABLE_SIZES]   # month, day, weekday, hour
    pe = sinusoid_table(SEQ_LEN, D_MODEL)                        # pe[:L]
    w_tab = jnp.concatenate(tables + [pe], axis=0)               # (76 + L, D)

    # TODO(synk): Dropout(p=0.1) is the identity in eval mode and is intentionally omitted.
    out = data_embedding(x, x_mark, w_conv, w_tab)
    jax.block_until_ready(out)
    assert out.shape == (BATCH, SEQ_LEN, D_MODEL)

    ref = reference(x, x_mark, w_conv, tables, pe)
    err = float(jnp.max(jnp.abs(out - ref)))
    assert err < 5e-2, f"max abs err vs reference: {err}"   # loose bound covers MXU rounding
    print("KERNEL_OK")
</pallas_src>

<mosaic_0001>
module attributes {stable_mosaic.version = 11 : i64} {
  func.func @data_embedding_kernel(%arg0: i32, %arg1: memref<2x8x4xf32, #tpu.memory_space<vmem>>, %arg2: memref<16x5xi32, #tpu.memory_space<vmem>>, %arg3: memref<3x4x128xf32, #tpu.memory_space<vmem>>, %arg4: memref<84x128xf32, #tpu.memory_space<vmem>>, %arg5: memref<16x128xf32, #tpu.memory_space<vmem>>) attributes {dimension_semantics = [#tpu.dimension_semantics<arbitrary>], iteration_bounds = array<i64: 1>, scalar_prefetch = 0 : i64, scratch_operands = 0 : i64, tpu.core_type = #tpu.core_type<tc>, window_params = [{pipeline_mode = #tpu.pipeline_mode<synchronous>, transform_indices = @transform_0, window_bounds = array<i64: 2, 8, 4>}, {pipeline_mode = #tpu.pipeline_mode<synchronous>, transform_indices = @transform_1, window_bounds = array<i64: 16, 5>}, {pipeline_mode = #tpu.pipeline_mode<synchronous>, transform_indices = @transform_2, window_bounds = array<i64: 3, 4, 128>}, {pipeline_mode = #tpu.pipeline_mode<synchronous>, transform_indices = @transform_3, window_bounds = array<i64: 84, 128>}, {pipeline_mode = #tpu.pipeline_mode<synchronous>, transform_indices = @transform_4, window_bounds = array<i64: 16, 128>}]} {
    %c0 = arith.constant 0 : index
    %c0_0 = arith.constant 0 : index
    %c0_1 = arith.constant 0 : index
    %0 = vector.load %arg1[%c0, %c0_0, %c0_1] : memref<2x8x4xf32, #tpu.memory_space<vmem>>, vector<2x8x4xf32>
    %1 = vector.extract_strided_slice %0 {offsets = [0, 7, 0], sizes = [2, 1, 4], strides = [1, 1, 1]} : vector<2x8x4xf32> to vector<2x1x4xf32>
    %2 = vector.extract_strided_slice %0 {offsets = [0, 0, 0], sizes = [2, 7, 4], strides = [1, 1, 1]} : vector<2x8x4xf32> to vector<2x7x4xf32>
    %3 = tpu.concatenate %1, %2 in 1 : vector<2x1x4xf32>, vector<2x7x4xf32> -> vector<2x8x4xf32>
    %4 = vector.shape_cast %3 : vector<2x8x4xf32> to vector<16x4xf32>
    %5 = vector.extract_strided_slice %0 {offsets = [0, 1, 0], sizes = [2, 7, 4], strides = [1, 1, 1]} : vector<2x8x4xf32> to vector<2x7x4xf32>
    %6 = vector.extract_strided_slice %0 {offsets = [0, 0, 0], sizes = [2, 1, 4], strides = [1, 1, 1]} : vector<2x8x4xf32> to vector<2x1x4xf32>
    %7 = tpu.concatenate %5, %6 in 1 : vector<2x7x4xf32>, vector<2x1x4xf32> -> vector<2x8x4xf32>
    %8 = vector.shape_cast %7 : vector<2x8x4xf32> to vector<16x4xf32>
    %9 = vector.shape_cast %0 : vector<2x8x4xf32> to vector<16x4xf32>
    %10 = tpu.iota {dimensions = array<i32: 1>} : vector<16x84xi32>
    %c0_2 = arith.constant 0 : index
    %c0_3 = arith.constant 0 : index
    %11 = vector.load %arg2[%c0_2, %c0_3] : memref<16x5xi32, #tpu.memory_space<vmem>>, vector<16x5xi32>
    %12 = vector.extract_strided_slice %11 {offsets = [0, 0], sizes = [16, 1], strides = [1, 1]} : vector<16x5xi32> to vector<16x1xi32>
    %13 = vector.broadcast %12 : vector<16x1xi32> to vector<16x84xi32>
    %14 = arith.cmpi eq, %10, %13 : vector<16x84xi32>
    %15 = vector.extract_strided_slice %11 {offsets = [0, 1], sizes = [16, 1], strides = [1, 1]} : vector<16x5xi32> to vector<16x1xi32>
    %16 = vector.broadcast %15 : vector<16x1xi32> to vector<16x84xi32>
    %17 = arith.cmpi eq, %10, %16 : vector<16x84xi32>
    %18 = arith.ori %14, %17 : vector<16x84xi1>
    %19 = vector.extract_strided_slice %11 {offsets = [0, 2], sizes = [16, 1], strides = [1, 1]} : vector<16x5xi32> to vector<16x1xi32>
    %20 = vector.broadcast %19 : vector<16x1xi32> to vector<16x84xi32>
    %21 = arith.cmpi eq, %10, %20 : vector<16x84xi32>
    %22 = arith.ori %18, %21 : vector<16x84xi1>
    %23 = vector.extract_strided_slice %11 {offsets = [0, 3], sizes = [16, 1], strides = [1, 1]} : vector<16x5xi32> to vector<16x1xi32>
    %24 = vector.broadcast %23 : vector<16x1xi32> to vector<16x84xi32>
    %25 = arith.cmpi eq, %10, %24 : vector<16x84xi32>
    %26 = arith.ori %22, %25 : vector<16x84xi1>
    %27 = vector.extract_strided_slice %11 {offsets = [0, 4], sizes = [16, 1], strides = [1, 1]} : vector<16x5xi32> to vector<16x1xi32>
    %28 = vector.broadcast %27 : vector<16x1xi32> to vector<16x84xi32>
    %29 = arith.cmpi eq, %10, %28 : vector<16x84xi32>
    %30 = arith.ori %26, %29 : vector<16x84xi1>
    %31 = arith.extui %30 : vector<16x84xi1> to vector<16x84xi32>
    %32 = arith.sitofp %31 : vector<16x84xi32> to vector<16x84xf32>
    %c0_4 = arith.constant 0 : index
    %c0_5 = arith.constant 0 : index
    %33 = vector.load %arg4[%c0_4, %c0_5] : memref<84x128xf32, #tpu.memory_space<vmem>>, vector<84x128xf32>
    %cst = arith.constant dense<0.000000e+00> : vector<16x128xf32>
    %34 = tpu.matmul %32, %33, %cst {dimension_numbers = #tpu.dot_dimension_numbers<[1], [0], [0], [1], [0, 0, 1, 1], [], []>} : vector<16x84xf32>, vector<84x128xf32>, vector<16x128xf32> -> vector<16x128xf32>
    %c0_6 = arith.constant 0 : index
    %c0_7 = arith.constant 0 : index
    %c0_8 = arith.constant 0 : index
    %35 = vector.load %arg3[%c0_6, %c0_7, %c0_8] : memref<3x4x128xf32, #tpu.memory_space<vmem>>, vector<1x4x128xf32>
    %36 = vector.shape_cast %35 : vector<1x4x128xf32> to vector<4x128xf32>
    %cst_9 = arith.constant dense<0.000000e+00> : vector<16x128xf32>
    %37 = tpu.matmul %4, %36, %cst_9 {dimension_numbers = #tpu.dot_dimension_numbers<[1], [0], [0], [1], [0, 0, 1, 1], [], []>} : vector<16x4xf32>, vector<4x128xf32>, vector<16x128xf32> -> vector<16x128xf32>
    %38 = arith.addf %34, %37 : vector<16x128xf32>
    %c1 = arith.constant 1 : index
    %c0_10 = arith.constant 0 : index
    %c0_11 = arith.constant 0 : index
    %39 = vector.load %arg3[%c1, %c0_10, %c0_11] : memref<3x4x128xf32, #tpu.memory_space<vmem>>, vector<1x4x128xf32>
    %40 = vector.shape_cast %39 : vector<1x4x128xf32> to vector<4x128xf32>
    %cst_12 = arith.constant dense<0.000000e+00> : vector<16x128xf32>
    %41 = tpu.matmul %9, %40, %cst_12 {dimension_numbers = #tpu.dot_dimension_numbers<[1], [0], [0], [1], [0, 0, 1, 1], [], []>} : vector<16x4xf32>, vector<4x128xf32>, vector<16x128xf32> -> vector<16x128xf32>
    %42 = arith.addf %38, %41 : vector<16x128xf32>
    %c2 = arith.constant 2 : index
    %c0_13 = arith.constant 0 : index
    %c0_14 = arith.constant 0 : index
    %43 = vector.load %arg3[%c2, %c0_13, %c0_14] : memref<3x4x128xf32, #tpu.memory_space<vmem>>, vector<1x4x128xf32>
    %44 = vector.shape_cast %43 : vector<1x4x128xf32> to vector<4x128xf32>
    %cst_15 = arith.constant dense<0.000000e+00> : vector<16x128xf32>
    %45 = tpu.matmul %8, %44, %cst_15 {dimension_numbers = #tpu.dot_dimension_numbers<[1], [0], [0], [1], [0, 0, 1, 1], [], []>} : vector<16x4xf32>, vector<4x128xf32>, vector<16x128xf32> -> vector<16x128xf32>
    %46 = arith.addf %42, %45 : vector<16x128xf32>
    %c0_16 = arith.constant 0 : index
    %c0_17 = arith.constant 0 : index
    %47 = vector.load %arg5[%c0_16, %c0_17] : memref<16x128xf32, #tpu.memory_space<vmem>>, vector<16x128xf32>
    tpu.vector_store %arg5[%c0_16, %c0_17], %46 {strides = array<i32>} : memref<16x128xf32, #tpu.memory_space<vmem>>, vector<16x128xf32>,
    return
  }
  func.func @transform_0(%arg0: i32) -> (i32, i32, i32) {
    %c0_i32 = arith.constant 0 : i32
    %c0_i32_0 = arith.constant 0 : i32
    %c0_i32_1 = arith.constant 0 : i32
    %c0_i32_2 = arith.constant 0 : i32
    return %c0_i32, %c0_i32_0, %c0_i32_1 : i32, i32, i32
  }
  func.func @transform_1(%arg0: i32) -> (i32, i32) {
    %c0_i32 = arith.constant 0 : i32
    %c0_i32_0 = arith.constant 0 : i32
    %c0_i32_1 = arith.constant 0 : i32
    return %c0_i32, %c0_i32_0 : i32, i32
  }
  func.func @transform_2(%arg0: i32) -> (i32, i32, i32) {
    %c0_i32 = arith.constant 0 : i32
    %c0_i32_0 = arith.constant 0 : i32
    %c0_i32_1 = arith.constant 0 : i32
    %c0_i32_2 = arith.constant 0 : i32
    return %c0_i32, %c0_i32_0, %c0_i32_1 : i32, i32, i32
  }
  func.func @transform_3(%arg0: i32) -> (i32, i32) {
    %c0_i32 = arith.constant 0 : i32
    %c0_i32_0 = arith.constant 0 : i32
    %c0_i32_1 = arith.constant 0 : i32
    return %c0_i32, %c0_i32_0 : i32, i32
  }
  func.func @transform_4(%arg0: i32) -> (i32, i32) {
    %c0_i32 = arith.constant 0 : i32
    %c0_i32_0 = arith.constant 0 : i32
    %c0_i32_1 = arith.constant 0 : i32
    return %c0_i32, %c0_i32_0 : i32, i32
  }
}

</mosaic_0001>

<bundles_post_ra>
// kernel: tpu_custom_call.1
= control target key start
LH: loop header
LB: loop body
LE: loop exit
PB: predicated region body
PF: predicated region fallthrough
CT: control target
= control target key end

     0   :  { %9 = vsyncpa [#allocation3], 0  ;;  %s762_s0 = inlined_call_operand.vmem [shape: f32[2,8,4], index: 0, kind: input, shape index: {}]   ;;  %s763_s1 = inlined_call_operand.vmem [shape: s32[16,5], index: 1, kind: input, shape index: {}]   ;;  %s764_s2 = inlined_call_operand.vmem [shape: f32[3,4,128], index: 2, kind: input, shape index: {}]   ;;  %s765_s3 = inlined_call_operand.hbm [shape: f32[84,128], index: 3, kind: input, shape index: {}]   ;;  %s766_s4 = inlined_call_operand.hbm [shape: f32[16,128], index: 4, kind: output, shape index: {}]  }
   0x1   :  { %10 = vsyncpa [#allocation4], 0  ;;  %s653_s15 = smov [#allocation2]   ;;  %s605_s19 = scalar_lea.hbm %s765_s3, 1408 }
   0x2   :  { %s22_s16 = sshll.u32 %s653_s15, 4  ;;  %p606_p0 = scmp.ne.s32.totalorder %s765_s3, %s605_s19  ;;  %s23_s16 = int_to_ptr.vmem [resolvable:$true] %s22_s16 }
   0x3   :  { %p609_p1 = scmp.lt.u32.totalorder %s605_s19, %s765_s3 }
   0x5   :  { %p611_p2 = pnand %p609_p1, %p606_p0 }
   0x7   :  { %614 = shalt.err (!%p611_p2)
}
   0x8   :  { %s615_s24 = scalar_lea.vmem %s23_s16, 1408  ;;  %p620_p4 = scmp.lt.s32.totalorder %s23_s16, %s23_s16 }
   0x9   :  { %p616_p3 = scmp.ne.s32.totalorder %s23_s16, %s615_s24  ;;  %p621_p5 = scmp.lt.s32.totalorder %s615_s24, %s615_s24 }
   0xb   :  { %p622_p6 = por %p621_p5, %p620_p4 }
   0xd   :  { %p623_p7 = pnand %p622_p6, %p616_p3 }
   0xf   :  { %626 = shalt.err (!%p623_p7)
}
  0x10   :  { %s654_s25 = smov 128   ;;  %s655_s26 = smov 8  }
  0x11   :  { %28 = dma.hbm_to_vmem [thread:$0]  %s765_s3, 1408, %s23_s16, [#allocation3], %s654_s25, %s654_s25, %s655_s26  }
  0x12   :  { %649 = dma.done.wait [#allocation3], 1408  }
  0x13   :  { %650 = vsyncadd [#allocation3], 4294965888  ;;  %v656_v0 = vmov 0   ;;  %v706_v1 = vld [vmem:[%s763_s1 + $0x8] sm:$0xff]  ;;  %v52_v2 = vld [vmem:[%s763_s1] sm:$0xff]  ;;  %v657_v6 = vmov 1   ;;  %v50_v34 = vlaneseq }
  0x14   :  { %598 = vset.pattern.permute.xlu1 %v656_v0  ;;  %596 = vset.pattern.permute.xlu0 %v656_v0  ;;  %v106_v3 = vld [vmem:[#allocation2] sm:$0xff]  ;;  %v107_v4 = vld [vmem:[#allocation2 + $0x8] sm:$0xff]  ;;  %v32_v7 = vld [vmem:[%s762_s0] sm:$0xff]  ;;  %vm125_vm0 = vcmask 1043456   ;;  %vm118_vm1 = vcmask 31744   ;;  %v658_v15 = vmov 2  }
  0x15   :  { %58 = vperm.xlu1 %598, %v706_v1   ;;  %55 = vperm.xlu0 %596, %v52_v2   ;;  %v560_v5 = vpack.c.bf16 %v107_v4, %v106_v3  ;;  %v117_v8 = vld [vmem:[%s764_s2] sm:$0xf]  ;;  %v36_v9 = vrot.slane %v32_v7, 7  ;;  %v33_v10 = vld [vmem:[%s762_s0 + $0x8] sm:$0xff]  ;;  %v490_v16 = vld [vmem:[%s764_s2 + $0x4] sm:$0xf] }
  0x16   :  { %520 = vmatprep.subr.msk.mxu0 %vm125_vm0, %v117_v8  ;;  %v108_v11 = vld [vmem:[#allocation2 + $0x10] sm:$0xff]  ;;  %v109_v12 = vld [vmem:[#allocation2 + $0x18] sm:$0xff]  ;;  %v37_v13 = vrot.slane %v33_v10, 7  ;;  %v110_v17 = vld [vmem:[#allocation2 + $0x20] sm:$0xff]  ;;  %v43_v20 = vrot.slane %v32_v7, 1  ;;  %v659_v21 = vmov 3  }
  0x17   :  { %561 = vmatprep.subr.bf16.mxu1 %v560_v5  ;;  %521 = vmatpush3.msk.msra.mxu0 %vm125_vm0, %v117_v8  ;;  %v564_v14 = vpack.c.bf16 %v109_v12, %v108_v11  ;;  %v111_v18 = vld [vmem:[#allocation2 + $0x28] sm:$0xff]  ;;  %v660_v22 = vmov 4   ;;  %v112_v23 = vld [vmem:[#allocation2 + $0x30] sm:$0xff]  ;;  %v113_v24 = vld [vmem:[#allocation2 + $0x38] sm:$0xff]  ;;  %v44_v29 = vrot.slane %v33_v10, 1  ;;  %v51_v37 = vand.u32 127, %v50_v34 }
  0x18   :  { %563 = vmatpush3.bf16.msra.mxu1 %v560_v5  ;;  %522 = vmatprep.mubr.msk.f32.mxu0 %vm118_vm1, %v36_v9  ;;  %v568_v19 = vpack.c.bf16 %v111_v18, %v110_v17  ;;  %v572_v25 = vpack.c.bf16 %v113_v24, %v112_v23  ;;  %v494_v26 = vld [vmem:[%s764_s2 + $0x8] sm:$0xf]  ;;  %v114_v27 = vld [vmem:[#allocation2 + $0x40] sm:$0xff]  ;;  %v115_v28 = vld [vmem:[#allocation2 + $0x48] sm:$0xff]  ;;  %vm204_vm10 = vcmask 687104   ;;  %v661_v43 = vmov 0.0  }
  0x19   :  { %599 = vset.pattern.permute.xlu1 %v657_v6  ;;  %597 = vset.pattern.permute.xlu0 %v657_v6  ;;  %v576_v30 = vpack.c.bf16 %v115_v28, %v114_v27  ;;  %v116_v31 = vld [vmem:[#allocation2 + $0x50] sm:$0xf]  ;;  %s662_s2 = smov [#allocation5]  }
  0x1a   :  { %66 = vperm.xlu1 %599, %v706_v1   ;;  %63 = vperm.xlu0 %597, %v52_v2   ;;  %s470_s14 = sshll.u32 %s662_s2, 4  ;;  %s471_s14 = int_to_ptr.vmem [resolvable:$true] %s470_s14 }
  0x1b   :  { %523 = vmatmul.mubr.msk.f32.vlgmr.msra.gmra.mrb[0].mxu0 %vm118_vm1, %v37_v13  ;;  %565 = vmatprep.subr.bf16.mxu1 %v564_v14  ;;  %s627_s15 = scalar_lea.vmem %s471_s14, 256  ;;  %p632_p9 = scmp.lt.s32.totalorder %s471_s14, %s471_s14 }
  0x1c   :  { %567 = vmatpush3.bf16.msra.mxu1 %v564_v14  ;;  %550 = vmatprep.subr.msk.mxu0 %vm125_vm0, %v490_v16  ;;  %p628_p8 = scmp.ne.s32.totalorder %s471_s14, %s627_s15  ;;  %p633_p10 = scmp.lt.s32.totalorder %s627_s15, %s627_s15 }
  0x1d   :  { %551 = vmatpush3.msk.msra.mxu0 %vm125_vm0, %v490_v16  ;;  %552 = vmatprep.mubr.msk.f32.mxu0 %vm118_vm1, %v32_v7 }
  0x1e   :  { %600 = vset.pattern.permute.xlu1 %v658_v15  ;;  %601 = vset.pattern.permute.xlu0 %v658_v15  ;;  %p634_p11 = por %p633_p10, %p632_p9 }
  0x1f   :  { %73 = vperm.xlu1 %600, %v52_v2   ;;  %76 = vperm.xlu0 %601, %v706_v1  }
  0x20   :  { %553 = vmatmul.mubr.msk.f32.vlgmr.msra.gmra.mrb[2].mxu0 %vm118_vm1, %v33_v10  ;;  %569 = vmatprep.subr.bf16.mxu1 %v568_v19  ;;  %p635_p12 = pnand %p634_p11, %p628_p8 }
  0x21   :  { %571 = vmatpush3.bf16.msra.mxu1 %v568_v19  ;;  %557 = vmatprep.mubr.msk.f32.mxu0 %vm118_vm1, %v43_v20 }
  0x22   :  { %573 = vmatprep.subr.bf16.mxu1 %v572_v25  ;;  %555 = vmatprep.subr.msk.mxu0 %vm125_vm0, %v494_v26 }
  0x23   :  { %602 = vset.pattern.permute.xlu1 %v659_v21  ;;  %603 = vset.pattern.permute.xlu0 %v660_v22 }
  0x24   :  { %83 = vperm.xlu1 %602, %v52_v2   ;;  %93 = vperm.xlu0 %603, %v52_v2  }
  0x25   :  { %556 = vmatpush3.msk.msra.mxu0 %vm125_vm0, %v494_v26  ;;  %575 = vmatpush3.bf16.msra.mxu1 %v572_v25 }
  0x26   :  { %577 = vmatprep.subr.bf16.mxu1 %v576_v30 }
  0x28   :  { %86 = vperm.xlu1 %602, %v706_v1   ;;  %558 = vmatmul.mubr.msk.f32.vlgmr.msra.gmra.mrb[2].mxu0 %vm118_vm1, %v44_v29 }
  0x29   :  { %579 = vmatpush3.bf16.msra.mxu1 %v576_v30 }
  0x2a   :  { %545 = vmatprep.subr.msk.mxu1 %vm125_vm0, %v116_v31 }
  0x2c   :  { %604 = vset.pattern.permute.xlu1 %v660_v22 }
  0x2d   :  { %96 = vperm.xlu1 %604, %v706_v1   ;;  %546 = vmatpush3.msk.msra.mxu1 %vm125_vm0, %v116_v31 }
  0x94   :  { %v59_v32 = vpop.permute.xlu1 %58  ;;  %v56_v33 = vpop.permute.xlu0 %55 }
  0x95   :  { %vm60_vm2 = vcmp.eq.s32.totalorder %v51_v37, %v56_v33  ;;  %vm61_vm14 = vcmp.eq.s32.totalorder %v51_v37, %v59_v32 }
  0x99   :  { %v67_v35 = vpop.permute.xlu1 %66  ;;  %v64_v36 = vpop.permute.xlu0 %63 }
  0x9a   :  { %vm68_vm3 = vcmp.eq.s32.totalorder %v51_v37, %v64_v36  ;;  %vm69_vm12 = vcmp.eq.s32.totalorder %v51_v37, %v67_v35 }
  0x9b   :  { %vm70_vm4 = vmor %vm60_vm2, %vm68_vm3 }
  0x9c   :  { %vm71_vm0 = vmor %vm61_vm14, %vm69_vm12 }
  0x9e   :  { %v74_v38 = vpop.permute.xlu1 %73  ;;  %v77_v39 = vpop.permute.xlu0 %76 }
  0x9f   :  { %vm78_vm5 = vcmp.eq.s32.totalorder %v51_v37, %v74_v38  ;;  %vm79_vm13 = vcmp.eq.s32.totalorder %v51_v37, %v77_v39 }
  0xa0   :  { %vm80_vm6 = vmor %vm70_vm4, %vm78_vm5 }
  0xa1   :  { %vm81_vm1 = vmor %vm71_vm0, %vm79_vm13 }
  0xa3   :  { %v84_v40 = vpop.permute.xlu1 %83  ;;  %v94_v41 = vpop.permute.xlu0 %93 }
  0xa4   :  { %vm88_vm7 = vcmp.eq.s32.totalorder %v51_v37, %v84_v40  ;;  %vm98_vm8 = vcmp.eq.s32.totalorder %v51_v37, %v94_v41 }
  0xa5   :  { %vm90_vm9 = vmor %vm80_vm6, %vm88_vm7 }
  0xa6   :  { %vm100_vm11 = vmor %vm90_vm9, %vm98_vm8 }
  0xa7   :  { %v87_v42 = vpop.permute.xlu1 %86  ;;  %v482_v44 = vsel %vm100_vm11, 1.0, %v661_v43 }
  0xa8   :  { %547 = vmatprep.mubr.msk.f32.mxu1 %vm204_vm10, %v482_v44  ;;  %vm89_vm15 = vcmp.eq.s32.totalorder %v51_v37, %v87_v42 }
  0xa9   :  { %vm91_vm2 = vmor %vm81_vm1, %vm89_vm15 }
  0xac   :  { %v97_v45 = vpop.permute.xlu1 %96 }
  0xad   :  { %vm99_vm3 = vcmp.eq.s32.totalorder %v51_v37, %v97_v45 }
  0xae   :  { %vm101_vm4 = vmor %vm91_vm2, %vm99_vm3 }
  0xaf   :  { %v483_v46 = vsel %vm101_vm4, 1.0, %v661_v43 }
  0xb0   :  { %548 = vmatmul.mubr.msk.f32.vlgmr.msra.gmra.mrb[0].mxu1 %vm204_vm10, %v483_v46 }
  0xee   :  { %v524_v47 = vpop.f32.mrb[0].mxu0 }
  0xef   :  { %v195_v48 = vpop.f32.mrb[1].mxu0 }
  0xfb   :  { %v559_v49 = vpop.f32.mrb[2].mxu0 }
  0xfc   :  { %v452_v50 = vpop.f32.mrb[3].mxu0 }
 0x183   :  { %v549_v51 = vpop.f32.mrb[0].mxu1 }
 0x184   :  { %v286_v52 = vadd.f32 %v549_v51, %v524_v47  ;;  %v280_v53 = vpop.f32.mrb[1].mxu1 }
 0x185   :  { %v281_v54 = vadd.f32 %v280_v53, %v195_v48 }
 0x186   :  { %v581_v55 = vadd.f32 %v559_v49, %v286_v52 }
 0x187   :  { %v583_v56 = vadd.f32 %v452_v50, %v281_v54 }
 0x188   :  { %464 = vst [vmem:[#allocation5 + $0x8] sm:$0xff] %v581_v55 }
 0x189   :  { %463 = vst [vmem:[#allocation5] sm:$0xff] %v583_v56 }
 0x18a   :  { %638 = shalt.err (!%p635_p12)
}
 0x18b   :  { %s639_s18 = scalar_lea.hbm %s766_s4, 256 }
 0x18c   :  { %p640_p13 = scmp.ne.s32.totalorder %s766_s4, %s639_s18  ;;  %p643_p0 = scmp.lt.u32.totalorder %s639_s18, %s766_s4 }
 0x18e   :  { %p645_p1 = pnand %p643_p0, %p640_p13 }
 0x190   :  { %648 = shalt.err (!%p645_p1)
}
 0x191   :  { %476 = dma.vmem_to_hbm [thread:$0]  %s471_s14, 256, %s766_s4, [#allocation4], %s654_s25, %s654_s25, %s655_s26  }
 0x192   :  { %651 = dma.done.wait [#allocation4], 256  }
 0x193   :  { %652 = vsyncadd [#allocation4], 4294967040 }
 0x194   :  { %480 = vsyncpa [#allocation3], 1 }
 0x195   :  { %481 = vsyncpa [#allocation4], 1 }

</bundles_post_ra>
